<compile_context>
chip_gen: v5e
topology: v5e:2x2
jax: 0.10.0
libtpu: 0.0.40
codegen_flags: <defaults>
</compile_context>

<pallas_src>
import functools

import jax
import jax.numpy as jnp
from jax.experimental import pallas as pl
from jax.experimental.pallas import tpu as pltpu

LANES = 128
MAX_TILE_ROWS = 1024   # 1024x128 f32 tile = 512 KiB/stream; 2 streams double-
                       # buffered + acc ~= 2.5 MiB VMEM -> safe on v5e/v6e/v7x.
NCORES = 2             # leading "parallel" grid axis (v7x megacore split);
                       # a serial no-cost loop on single-TC chips.


def _focal_kernel(x_ref, t_ref, out_ref, acc_ref, *,
                  alpha, gamma, eps, n_valid, tile_rows,
                  tiles_total, tiles_per_core):
    t_idx = pl.program_id(1)

    @pl.when(t_idx == 0)
    def _():
        acc_ref[...] = jnp.zeros_like(acc_ref)

    # Upcast in-kernel; HBM streams stay at their native width.
    x = x_ref[...].astype(jnp.float32)
    tgt = t_ref[...].astype(jnp.float32)

    # Reference semantics: inputs.clamp(min=-20, max=20)
    x = jnp.clip(x, -20.0, 20.0)

    # One exp, one log, one approx-reciprocal per element:
    #   e          = exp(-|x|)
    #   sigmoid(x) = where(x>=0, 1, e) / (1 + e)
    #   bce(x, t)  = max(x, 0) - x*t + log1p(e)      (stable BCE-with-logits)
    e = jnp.exp(-jnp.abs(x))
    inv_1pe = pl.reciprocal(1.0 + e, approx=True)
    p = jnp.where(x >= 0.0, 1.0, e) * inv_1pe
    ce = jnp.maximum(x, 0.0) - x * tgt + jnp.log1p(e)

    p_t = p * tgt + (1.0 - p) * (1.0 - tgt)
    w = jnp.maximum(1.0 - p_t, eps)
    if gamma == 2.0:            # module default: a single VPU multiply
        focal_w = w * w
    elif gamma == 1.0:
        focal_w = w
    else:                       # generic fallback (EUP log+exp)
        focal_w = jnp.power(w, gamma)
    loss = focal_w * ce
    if alpha >= 0:
        alpha_t = alpha * tgt + (1.0 - alpha) * (1.0 - tgt)
        loss = alpha_t * loss

    g_tile = pl.program_id(0) * tiles_per_core + t_idx
    tile_elems = tile_rows * LANES
    # First global tile containing padded / out-of-range elements (static).
    mask_from_tile = n_valid // tile_elems

    @pl.when(g_tile < mask_from_tile)
    def _():
        acc_ref[...] += loss

    @pl.when(g_tile >= mask_from_tile)
    def _():
        base = g_tile * tile_elems
        row = jax.lax.broadcasted_iota(jnp.int32, (tile_rows, LANES), 0)
        col = jax.lax.broadcasted_iota(jnp.int32, (tile_rows, LANES), 1)
        idx = base + row * LANES + col
        acc_ref[...] += jnp.where(idx < n_valid, loss, 0.0)

    @pl.when(t_idx == pl.num_programs(1) - 1)
    def _():
        # Defer heavy reduction to the epilogue: collapse to an (8,128)
        # per-core partial with VPU adds; final reduce happens in JAX.
        partial = acc_ref[...].reshape(tile_rows // 8, 8, LANES).sum(axis=0)
        out_ref[...] = partial.reshape(1, 8, LANES)


def focal_loss_sum(logits, targets, *, alpha=1.0, gamma=2.0, eps=1e-6):
    """FocalLoss(alpha, gamma, reduction='sum') on arbitrary-shaped tensors."""
    x = logits.reshape(-1)
    t = targets.reshape(-1)
    n = x.size

    # Pad only the sub-128 tail (most NCHW sizes need no pad at all).
    rem = (-n) % LANES
    if rem:
        x = jnp.pad(x, (0, rem))
        t = jnp.pad(t, (0, rem))
    rows = (n + rem) // LANES
    x2 = x.reshape(rows, LANES)
    t2 = t.reshape(rows, LANES)

    tile_rows = min(MAX_TILE_ROWS, pl.cdiv(rows, 8) * 8)
    tiles_total = pl.cdiv(rows, tile_rows)
    ncore = NCORES if tiles_total >= NCORES else 1
    tiles_per_core = pl.cdiv(tiles_total, ncore)

    def in_map(c, ti):
        # Clamp overshoot tiles (from the core split) onto the last real
        # block; their contribution is zeroed in-kernel by the iota mask.
        return (jnp.minimum(c * tiles_per_core + ti, tiles_total - 1), 0)

    kern = functools.partial(
        _focal_kernel, alpha=alpha, gamma=gamma, eps=eps, n_valid=n,
        tile_rows=tile_rows, tiles_total=tiles_total,
        tiles_per_core=tiles_per_core)

    out = pl.pallas_call(
        kern,
        out_shape=jax.ShapeDtypeStruct((ncore, 8, LANES), jnp.float32),
        grid_spec=pltpu.PrefetchScalarGridSpec(
            num_scalar_prefetch=0,
            grid=(ncore, tiles_per_core),
            in_specs=[
                pl.BlockSpec((tile_rows, LANES), in_map),
                pl.BlockSpec((tile_rows, LANES), in_map),
            ],
            out_specs=pl.BlockSpec((1, 8, LANES), lambda c, ti: (c, 0, 0)),
            scratch_shapes=[pltpu.VMEM((tile_rows, LANES), jnp.float32)],
        ),
        compiler_params=pltpu.CompilerParams(
            dimension_semantics=("parallel", "arbitrary")),
    )(x2, t2)
    return out.sum()


def nearest_resize_nchw(t, size):
    """Matches F.interpolate(target, size=size, mode='nearest') for NCHW."""
    _, _, H, W = t.shape
    oh, ow = size
    if (oh, ow) == (H, W):
        return t
    hi = jnp.floor(jnp.arange(oh) * (H / oh)).astype(jnp.int32)
    wi = jnp.floor(jnp.arange(ow) * (W / ow)).astype(jnp.int32)
    return t[:, :, hi, :][:, :, :, wi]


def deep_supervised_loss(inputs, target):
    """Deep_Supervised_Loss.forward: inputs is a list of logits (or one array)."""
    if isinstance(inputs, (list, tuple)):
        total = jnp.float32(0.0)
        for i, out in enumerate(inputs):
            weight = 1.0 / (2 ** i)
            tgt = nearest_resize_nchw(target, tuple(out.shape[2:]))
            total = total + weight * focal_loss_sum(out, tgt)
        return total
    return focal_loss_sum(inputs, target)


if __name__ == "__main__":
    key = jax.random.PRNGKey(0)
    k1, k2, k3 = jax.random.split(key, 3)

    # Deep-supervision list: full-res and half-res logits, NCHW.
    logits_full = jax.random.normal(k1, (2, 4, 16, 16), dtype=jnp.float32) * 3.0
    logits_half = jax.random.normal(k2, (2, 4, 8, 8), dtype=jnp.float32) * 3.0
    target = (jax.random.uniform(k3, (2, 4, 16, 16)) > 0.5).astype(jnp.float32)

    loss = deep_supervised_loss([logits_full, logits_half], target)
    jax.block_until_ready(loss)

    # Also exercise the single-output path.
    loss_single = deep_supervised_loss(logits_full, target)
    jax.block_until_ready(loss_single)

    print("KERNEL_OK")
</pallas_src>

<mosaic_0001>
module attributes {stable_mosaic.version = 11 : i64} {
  func.func @_focal_kernel(%arg0: i32, %arg1: i32, %arg2: memref<16x128xf32, #tpu.memory_space<vmem>>, %arg3: memref<16x128xf32, #tpu.memory_space<vmem>>, %arg4: memref<1x8x128xf32, #tpu.memory_space<vmem>>, %arg5: memref<16x128xf32, #tpu.memory_space<vmem>>) attributes {dimension_semantics = [#tpu.dimension_semantics<parallel>, #tpu.dimension_semantics<arbitrary>], iteration_bounds = array<i64: 1, 1>, scalar_prefetch = 0 : i64, scratch_operands = 1 : i64, tpu.core_type = #tpu.core_type<tc>, window_params = [{transform_indices = @transform_0, window_bounds = array<i64: 16, 128>}, {transform_indices = @transform_1, window_bounds = array<i64: 16, 128>}, {transform_indices = @transform_2, window_bounds = array<i64: 1, 8, 128>}]} {
    %c0_i32 = arith.constant 0 : i32
    %0 = arith.cmpi eq, %arg1, %c0_i32 : i32
    %1 = arith.extui %0 : i1 to i32
    %c0_i32_0 = arith.constant 0 : i32
    %2 = arith.cmpi ne, %1, %c0_i32_0 : i32
    scf.if %2 {
      %cst_23 = arith.constant 0.000000e+00 : f32
      %59 = vector.broadcast %cst_23 : f32 to vector<16x128xf32>
      %c0_24 = arith.constant 0 : index
      %c0_25 = arith.constant 0 : index
      %60 = vector.load %arg5[%c0_24, %c0_25] : memref<16x128xf32, #tpu.memory_space<vmem>>, vector<16x128xf32>
      tpu.vector_store %arg5[%c0_24, %c0_25], %59 {strides = array<i32>} : memref<16x128xf32, #tpu.memory_space<vmem>>, vector<16x128xf32>,
    } else {
    }
    %c0 = arith.constant 0 : index
    %c0_1 = arith.constant 0 : index
    %3 = vector.load %arg2[%c0, %c0_1] : memref<16x128xf32, #tpu.memory_space<vmem>>, vector<16x128xf32>
    %c0_2 = arith.constant 0 : index
    %c0_3 = arith.constant 0 : index
    %4 = vector.load %arg3[%c0_2, %c0_3] : memref<16x128xf32, #tpu.memory_space<vmem>>, vector<16x128xf32>
    %cst = arith.constant -2.000000e+01 : f32
    %cst_4 = arith.constant 2.000000e+01 : f32
    %5 = vector.broadcast %cst : f32 to vector<16x128xf32>
    %6 = arith.maximumf %5, %3 : vector<16x128xf32>
    %7 = vector.broadcast %cst_4 : f32 to vector<16x128xf32>
    %8 = arith.minimumf %7, %6 : vector<16x128xf32>
    %9 = math.absf %8 : vector<16x128xf32>
    %cst_5 = arith.constant 0.000000e+00 : f32
    %10 = vector.broadcast %cst_5 : f32 to vector<16x128xf32>
    %11 = arith.subf %10, %9 : vector<16x128xf32>
    %12 = math.exp %11 : vector<16x128xf32>
    %cst_6 = arith.constant 1.000000e+00 : f32
    %13 = vector.broadcast %cst_6 : f32 to vector<16x128xf32>
    %14 = arith.addf %13, %12 : vector<16x128xf32>
    %15 = tpu.reciprocal %14 {approx = true} : vector<16x128xf32> -> vector<16x128xf32>
    %cst_7 = arith.constant 0.000000e+00 : f32
    %16 = vector.broadcast %cst_7 : f32 to vector<16x128xf32>
    %17 = arith.cmpf oge, %8, %16 : vector<16x128xf32>
    %cst_8 = arith.constant 1.000000e+00 : f32
    %18 = vector.broadcast %cst_8 : f32 to vector<16x128xf32>
    %19 = arith.select %17, %18, %12 : vector<16x128xi1>, vector<16x128xf32>
    %20 = arith.mulf %19, %15 : vector<16x128xf32>
    %cst_9 = arith.constant 0.000000e+00 : f32
    %21 = vector.broadcast %cst_9 : f32 to vector<16x128xf32>
    %22 = arith.maximumf %8, %21 : vector<16x128xf32>
    %23 = arith.mulf %8, %4 : vector<16x128xf32>
    %24 = arith.subf %22, %23 : vector<16x128xf32>
    %25 = math.log1p %12 : vector<16x128xf32>
    %26 = arith.addf %24, %25 : vector<16x128xf32>
    %27 = arith.mulf %20, %4 : vector<16x128xf32>
    %cst_10 = arith.constant 1.000000e+00 : f32
    %28 = vector.broadcast %cst_10 : f32 to vector<16x128xf32>
    %29 = arith.subf %28, %20 : vector<16x128xf32>
    %cst_11 = arith.constant 1.000000e+00 : f32
    %30 = vector.broadcast %cst_11 : f32 to vector<16x128xf32>
    %31 = arith.subf %30, %4 : vector<16x128xf32>
    %32 = arith.mulf %29, %31 : vector<16x128xf32>
    %33 = arith.addf %27, %32 : vector<16x128xf32>
    %cst_12 = arith.constant 1.000000e+00 : f32
    %34 = vector.broadcast %cst_12 : f32 to vector<16x128xf32>
    %35 = arith.subf %34, %33 : vector<16x128xf32>
    %cst_13 = arith.constant 9.99999997E-7 : f32
    %36 = vector.broadcast %cst_13 : f32 to vector<16x128xf32>
    %37 = arith.maximumf %35, %36 : vector<16x128xf32>
    %38 = arith.mulf %37, %37 : vector<16x128xf32>
    %39 = arith.mulf %38, %26 : vector<16x128xf32>
    %cst_14 = arith.constant 1.000000e+00 : f32
    %40 = vector.broadcast %cst_14 : f32 to vector<16x128xf32>
    %41 = arith.mulf %40, %4 : vector<16x128xf32>
    %cst_15 = arith.constant 1.000000e+00 : f32
    %42 = vector.broadcast %cst_15 : f32 to vector<16x128xf32>
    %43 = arith.subf %42, %4 : vector<16x128xf32>
    %cst_16 = arith.constant 0.000000e+00 : f32
    %44 = vector.broadcast %cst_16 : f32 to vector<16x128xf32>
    %45 = arith.mulf %44, %43 : vector<16x128xf32>
    %46 = arith.addf %41, %45 : vector<16x128xf32>
    %47 = arith.mulf %46, %39 : vector<16x128xf32>
    %c1_i32 = arith.constant 1 : i32
    %48 = arith.muli %arg0, %c1_i32 : i32
    %49 = arith.addi %48, %arg1 : i32
    %c1_i32_17 = arith.constant 1 : i32
    %50 = arith.cmpi slt, %49, %c1_i32_17 : i32
    %51 = arith.extui %50 : i1 to i32
    %c0_i32_18 = arith.constant 0 : i32
    %52 = arith.cmpi ne, %51, %c0_i32_18 : i32
    scf.if %52 {
      %c0_23 = arith.constant 0 : index
      %c0_24 = arith.constant 0 : index
      %59 = vector.load %arg5[%c0_23, %c0_24] : memref<16x128xf32, #tpu.memory_space<vmem>>, vector<16x128xf32>
      %60 = arith.addf %59, %47 : vector<16x128xf32>
      %c0_25 = arith.constant 0 : index
      %c0_26 = arith.constant 0 : index
      %61 = vector.load %arg5[%c0_25, %c0_26] : memref<16x128xf32, #tpu.memory_space<vmem>>, vector<16x128xf32>
      tpu.vector_store %arg5[%c0_25, %c0_26], %60 {strides = array<i32>} : memref<16x128xf32, #tpu.memory_space<vmem>>, vector<16x128xf32>,
    } else {
    }
    %c1_i32_19 = arith.constant 1 : i32
    %53 = arith.cmpi sge, %49, %c1_i32_19 : i32
    %54 = arith.extui %53 : i1 to i32
    %c0_i32_20 = arith.constant 0 : i32
    %55 = arith.cmpi ne, %54, %c0_i32_20 : i32
    scf.if %55 {
      %c2048_i32 = arith.constant 2048 : i32
      %59 = arith.muli %49, %c2048_i32 : i32
      %60 = tpu.iota {dimensions = array<i32: 0>} : vector<16x128xi32>
      %61 = tpu.iota {dimensions = array<i32: 1>} : vector<16x128xi32>
      %c128_i32 = arith.constant 128 : i32
      %62 = vector.broadcast %c128_i32 : i32 to vector<16x128xi32>
      %63 = arith.muli %60, %62 : vector<16x128xi32>
      %64 = vector.broadcast %59 : i32 to vector<16x128xi32>
      %65 = arith.addi %64, %63 : vector<16x128xi32>
      %66 = arith.addi %65, %61 : vector<16x128xi32>
      %c0_23 = arith.constant 0 : index
      %c0_24 = arith.constant 0 : index
      %67 = vector.load %arg5[%c0_23, %c0_24] : memref<16x128xf32, #tpu.memory_space<vmem>>, vector<16x128xf32>
      %c2048_i32_25 = arith.constant 2048 : i32
      %68 = vector.broadcast %c2048_i32_25 : i32 to vector<16x128xi32>
      %69 = arith.cmpi slt, %66, %68 : vector<16x128xi32>
      %cst_26 = arith.constant 0.000000e+00 : f32
      %70 = vector.broadcast %cst_26 : f32 to vector<16x128xf32>
      %71 = arith.select %69, %47, %70 : vector<16x128xi1>, vector<16x128xf32>
      %72 = arith.addf %67, %71 : vector<16x128xf32>
      %c0_27 = arith.constant 0 : index
      %c0_28 = arith.constant 0 : index
      %73 = vector.load %arg5[%c0_27, %c0_28] : memref<16x128xf32, #tpu.memory_space<vmem>>, vector<16x128xf32>
      tpu.vector_store %arg5[%c0_27, %c0_28], %72 {strides = array<i32>} : memref<16x128xf32, #tpu.memory_space<vmem>>, vector<16x128xf32>,
    } else {
    }
    %c0_i32_21 = arith.constant 0 : i32
    %56 = arith.cmpi eq, %arg1, %c0_i32_21 : i32
    %57 = arith.extui %56 : i1 to i32
    %c0_i32_22 = arith.constant 0 : i32
    %58 = arith.cmpi ne, %57, %c0_i32_22 : i32
    scf.if %58 {
      %c0_23 = arith.constant 0 : index
      %c0_24 = arith.constant 0 : index
      %59 = vector.load %arg5[%c0_23, %c0_24] : memref<16x128xf32, #tpu.memory_space<vmem>>, vector<16x128xf32>
      %60 = vector.shape_cast %59 : vector<16x128xf32> to vector<2x8x128xf32>
      %cst_25 = arith.constant dense<0.000000e+00> : vector<8x128xf32>
      %61 = vector.multi_reduction <add>, %60, %cst_25 [0] : vector<2x8x128xf32> to vector<8x128xf32>
      %62 = vector.shape_cast %61 : vector<8x128xf32> to vector<1x8x128xf32>
      %c0_26 = arith.constant 0 : index
      %c0_27 = arith.constant 0 : index
      %c0_28 = arith.constant 0 : index
      %63 = vector.load %arg4[%c0_26, %c0_27, %c0_28] : memref<1x8x128xf32, #tpu.memory_space<vmem>>, vector<1x8x128xf32>
      tpu.vector_store %arg4[%c0_26, %c0_27, %c0_28], %62 {strides = array<i32>} : memref<1x8x128xf32, #tpu.memory_space<vmem>>, vector<1x8x128xf32>,
    } else {
    }
    return
  }
  func.func @transform_0(%arg0: i32, %arg1: i32) -> (i32, i32) {
    %c1_i32 = arith.constant 1 : i32
    %0 = arith.muli %arg0, %c1_i32 : i32
    %1 = arith.addi %0, %arg1 : i32
    %c0_i32 = arith.constant 0 : i32
    %2 = arith.minsi %1, %c0_i32 : i32
    %c0_i32_0 = arith.constant 0 : i32
    %c0_i32_1 = arith.constant 0 : i32
    return %2, %c0_i32_0 : i32, i32
  }
  func.func @transform_1(%arg0: i32, %arg1: i32) -> (i32, i32) {
    %c1_i32 = arith.constant 1 : i32
    %0 = arith.muli %arg0, %c1_i32 : i32
    %1 = arith.addi %0, %arg1 : i32
    %c0_i32 = arith.constant 0 : i32
    %2 = arith.minsi %1, %c0_i32 : i32
    %c0_i32_0 = arith.constant 0 : i32
    %c0_i32_1 = arith.constant 0 : i32
    return %2, %c0_i32_0 : i32, i32
  }
  func.func @transform_2(%arg0: i32, %arg1: i32) -> (i32, i32, i32) {
    %c0_i32 = arith.constant 0 : i32
    %c0_i32_0 = arith.constant 0 : i32
    %c0_i32_1 = arith.constant 0 : i32
    return %arg0, %c0_i32, %c0_i32_0 : i32, i32, i32
  }
}

</mosaic_0001>

<bundles_post_ra>
// kernel: tpu_custom_call.1
= control target key start
LH: loop header
LB: loop body
LE: loop exit
PB: predicated region body
PF: predicated region fallthrough
CT: control target
= control target key end

     0   :  { %7 = vsyncpa [#allocation4], 0  ;;  %s345_s0 = inlined_call_operand.hbm [shape: f32[16,128], index: 0, kind: input, shape index: {}]   ;;  %s346_s1 = inlined_call_operand.hbm [shape: f32[16,128], index: 1, kind: input, shape index: {}]   ;;  %s347_s2 = inlined_call_operand.hbm [shape: f32[1,8,128], index: 2, kind: output, shape index: {}]  }
   0x1   :  { %8 = vsyncpa [#allocation7], 0 }
   0x2   :  { %9 = vsyncpa [#allocation5], 0  ;;  %s20_s11 = sshll.u32 %s345_s0, 4  ;;  %s310_s12 = smov [#allocation3]   ;;  %s21_s11 = int_to_ptr.hbm [resolvable:$true] %s20_s11 }
   0x3   :  { %s22_s13 = sshll.u32 %s310_s12, 4  ;;  %s39_s16 = sshll.u32 %s346_s1, 4  ;;  %s23_s13 = int_to_ptr.vmem [resolvable:$true] %s22_s13  ;;  %s40_s16 = int_to_ptr.hbm [resolvable:$true] %s39_s16 }
   0x4   :  { %s311_s17 = smov 128   ;;  %s312_s18 = smov 8  }
   0x5   :  { %28 = dma.hbm_to_vmem [thread:$0]  %s21_s11, 256, %s23_s13, [#allocation4], %s311_s17, %s311_s17, %s312_s18  }
   0x6   :  { %s313_s19 = smov [#allocation6]  }
   0x7   :  { %s41_s20 = sshll.u32 %s313_s19, 4  ;;  %s42_s20 = int_to_ptr.vmem [resolvable:$true] %s41_s20 }
   0x8   :  { %47 = dma.hbm_to_vmem [thread:$0]  %s40_s16, 256, %s42_s20, [#allocation7], %s311_s17, %s311_s17, %s312_s18  }
   0x9   :  { %304 = dma.done.wait [#allocation4], 256  }
   0xa   :  { %305 = vsyncadd [#allocation4], 4294967040 }
   0xb   :  { %306 = dma.done.wait [#allocation7], 256  }
   0xc   :  { %307 = vsyncadd [#allocation7], 4294967040  ;;  %v70_v0 = vld [vmem:[#allocation3] sm:$0xff]  ;;  %v71_v1 = vld [vmem:[#allocation3 + $0x8] sm:$0xff]  ;;  %s314_s0 = smov [#allocation8]   ;;  %s198_s23 = sshll.u32 %s347_s2, 4  ;;  %s199_s23 = int_to_ptr.hbm [resolvable:$true] %s198_s23 }
   0xd   :  { %v213_v2 = vclamps-f32 %v70_v0, 20.0  ;;  %v214_v3 = vclamps-f32 %v71_v1, 20.0  ;;  %v72_v15 = vld [vmem:[#allocation6] sm:$0xff]  ;;  %v73_v17 = vld [vmem:[#allocation6 + $0x8] sm:$0xff]  ;;  %s196_s1 = sshll.u32 %s314_s0, 4  ;;  %s197_s1 = int_to_ptr.vmem [resolvable:$true] %s196_s1 }
   0xe   :  { %v126_v22 = vsub.f32 1.0, %v72_v15  ;;  %v127_v27 = vsub.f32 1.0, %v73_v17 }
   0xf   :  { %v78_v4 = vand.u32 2147483647, %v213_v2  ;;  %v79_v5 = vand.u32 2147483647, %v214_v3  ;;  %vm90_vm0 = vcmp.ge.f32.partialorder %v213_v2, 0.0  ;;  %vm91_vm1 = vcmp.ge.f32.partialorder %v214_v3, 0.0 }
  0x10   :  { %v96_v30 = vmax.f32 %v213_v2, 0.0  ;;  %v97_v31 = vmax.f32 %v214_v3, 0.0  ;;  %v98_v34 = vmul.f32 %v213_v2, %v72_v15  ;;  %v99_v35 = vmul.f32 %v214_v3, %v73_v17 }
  0x11   :  { %v80_v6 = vsub.f32 0.0, %v78_v4  ;;  %v81_v7 = vsub.f32 0.0, %v79_v5  ;;  %v140_v54 = vmul.f32 0.0, %v126_v22  ;;  %v141_v56 = vmul.f32 0.0, %v127_v27 }
  0x12   :  { %v100_v47 = vsub.f32 %v96_v30, %v98_v34  ;;  %v101_v49 = vsub.f32 %v97_v31, %v99_v35 }
  0x13   :  { %v82_v8 = vmul.f32 1.442695, %v80_v6  ;;  %v84_v9 = vmul.f32 1.442695, %v81_v7  ;;  %v142_v62 = vadd.f32 %v140_v54, %v72_v15  ;;  %v143_v0 = vadd.f32 %v141_v56, %v73_v17 }
  0x15   :  { %220 = vpow2.f32 %v82_v8 }
  0x16   :  { %222 = vpow2.f32 %v84_v9 }
  0x1b   :  { %v221_v10 = vpop.eup %220 }
  0x1c   :  { %v223_v11 = vpop.eup %222  ;;  %v86_v12 = vadd.f32 1.0, %v221_v10  ;;  %v105_v14 = vmul.f32 -0.5, %v221_v10  ;;  %v92_v18 = vsel %vm90_vm0, 1.0, %v221_v10  ;;  %v108_v25 = vand.u32 2147483647, %v221_v10 }
  0x1d   :  { %v87_v13 = vadd.f32 1.0, %v223_v11  ;;  %v114_v16 = vmul.f32 -0.5, %v223_v11  ;;  %v93_v19 = vsel %vm91_vm1, 1.0, %v223_v11  ;;  %v117_v32 = vand.u32 2147483647, %v223_v11 }
  0x1e   :  { %224 = vrcp.f32 %v86_v12  ;;  %v106_v21 = vadd.f32 1.0, %v105_v14  ;;  %vm336_vm2 = vcmp.lt.f32.partialorder %v108_v25, 0.0004427343 }
  0x1f   :  { %226 = vrcp.f32 %v87_v13  ;;  %v115_v26 = vadd.f32 1.0, %v114_v16  ;;  %vm118_vm3 = vcmp.lt.f32.partialorder %v117_v32, 0.0004427343 }
  0x20   :  { %228 = vlog2.f32 %v86_v12  ;;  %v107_v39 = vmul.f32 %v221_v10, %v106_v21 }
  0x21   :  { %230 = vlog2.f32 %v87_v13  ;;  %v116_v44 = vmul.f32 %v223_v11, %v115_v26 }
  0x24   :  { %v225_v20 = vpop.eup %224 }
  0x25   :  { %v227_v23 = vpop.eup %226  ;;  %v94_v24 = vmul.f32 %v225_v20, %v92_v18 }
  0x26   :  { %v229_v28 = vpop.eup %228  ;;  %v95_v29 = vmul.f32 %v227_v23, %v93_v19 }
  0x27   :  { %v231_v33 = vpop.eup %230  ;;  %v122_v36 = vmul.f32 %v94_v24, %v72_v15  ;;  %v124_v37 = vsub.f32 1.0, %v94_v24  ;;  %v104_v38 = vmul.f32 0.6931472, %v229_v28 }
  0x28   :  { %v123_v40 = vmul.f32 %v95_v29, %v73_v17  ;;  %v125_v41 = vsub.f32 1.0, %v95_v29  ;;  %v113_v43 = vmul.f32 0.6931472, %v231_v33 }
  0x29   :  { %v128_v45 = vmul.f32 %v126_v22, %v124_v37  ;;  %v110_v50 = vsel %vm336_vm2, %v107_v39, %v104_v38 }
  0x2a   :  { %v129_v46 = vmul.f32 %v127_v27, %v125_v41  ;;  %v119_v52 = vsel %vm118_vm3, %v116_v44, %v113_v43  ;;  %v120_v57 = vadd.f32 %v110_v50, %v100_v47 }
  0x2b   :  { %v130_v48 = vadd.f32 %v128_v45, %v122_v36  ;;  %v121_v59 = vadd.f32 %v119_v52, %v101_v49 }
  0x2c   :  { %v131_v51 = vadd.f32 %v129_v46, %v123_v40 }
  0x2d   :  { %v132_v53 = vsub.f32 1.0, %v130_v48 }
  0x2e   :  { %v133_v55 = vsub.f32 1.0, %v131_v51 }
  0x2f   :  { %v134_v58 = vmax.f32 %v132_v53, 1e-06 }
  0x30   :  { %v135_v60 = vmax.f32 %v133_v55, 1e-06 }
  0x31   :  { %v136_v61 = vmul.f32 %v134_v58, %v134_v58 }
  0x32   :  { %v137_v63 = vmul.f32 %v135_v60, %v135_v60 }
  0x33   :  { %v138_v1 = vmul.f32 %v136_v61, %v120_v57 }
  0x34   :  { %v139_v2 = vmul.f32 %v137_v63, %v121_v59 }
  0x35   :  { %v144_v3 = vmul.f32 %v142_v62, %v138_v1 }
  0x36   :  { %v145_v4 = vmul.f32 %v143_v0, %v139_v2 }
  0x38   :  { %v189_v5 = vadd.f32 %v145_v4, %v144_v3 }
  0x3a   :  { %190 = vst [vmem:[#allocation8] sm:$0xff] %v189_v5 }
  0x3b   :  { %201 = dma.vmem_to_hbm [thread:$0]  %s197_s1, 128, %s199_s23, [#allocation5]  }
  0x3c   :  { %308 = dma.done.wait [#allocation5], 128  }
  0x3d   :  { %309 = vsyncadd [#allocation5], 4294967168 }
  0x3e   :  { %206 = vsyncpa [#allocation4], 1 }
  0x3f   :  { %207 = vsyncpa [#allocation7], 1 }
  0x40   :  { %208 = vsyncpa [#allocation5], 1 }

</bundles_post_ra>
